<compile_context>
chip_gen: v5e
topology: v5e:2x2
jax: 0.10.0
libtpu: 0.0.40
codegen_flags: <defaults>
</compile_context>

<pallas_src>
import jax
import jax.numpy as jnp
from jax.experimental import pallas as pl
from jax.experimental.pallas import tpu as pltpu


_LANE_CANDIDATES = (1024, 512, 256, 128)
_TILE_BYTES = 4 * 1024 * 1024  # per-tile buffer; ~16 MiB resident with 2x in + 2x out


def _h_sigmoid_kernel(x_ref, o_ref):
    # relu6(x + 3) / 6 == clamp(x + 3, 0, 6) * (1/6).  Compute in f32 (free,
    # kernel is DMA-bound), cast on store.
    x = x_ref[...].astype(jnp.float32)
    o_ref[...] = (jnp.clip(x + 3.0, 0.0, 6.0) * (1.0 / 6.0)).astype(o_ref.dtype)


def _round_up(a, b):
    return -(-a // b) * b


def _pick_row_block(rows, sublane, rb_cap):
    """Rows per grid step: multiple of `sublane`, <= rb_cap, >=4 tiles when possible."""
    if rows < 2 * sublane:
        return rows  # single block spanning the full row extent (any size allowed)
    tiles = 4 if rows >= 4 * sublane else 2  # >=4 tiles keeps both v7x TCs busy
    rb = _round_up(pl.cdiv(rows, tiles), sublane)
    return max(sublane, min(rb, rb_cap))


def h_sigmoid(x, *, donate_input=False):
    """h_sigmoid forward for any-shaped float array (e.g. NCHW activations)."""
    orig_shape = x.shape
    total = x.size
    itemsize = jnp.dtype(x.dtype).itemsize
    sublane = 8 * max(1, 4 // itemsize)  # 8 rows for f32, 16 for bf16/f16

    # Lane width: largest multiple of 128 dividing the element count so the
    # 2D view below is a pure bitcast (no pad, no copy, lane-dense stores).
    lane = next((c for c in _LANE_CANDIDATES if total % c == 0), None)
    padded_total = total
    flat = x.reshape(-1)
    if lane is None:
        # TODO(synk): misaligned element counts still pay one pad + one slice
        # copy; rare for real activation shapes.
        lane = 128
        padded_total = _round_up(total, lane)
        flat = jnp.pad(flat, (0, padded_total - total))
    rows = padded_total // lane
    x2d = flat.reshape(rows, lane)

    # Tile sizing: ~4 MiB per buffer (dtype-aware) so double-buffered in+out
    # stays ~16 MiB resident on all of v5e / v6e / v7x.
    rb_cap = max(sublane, (_TILE_BYTES // (lane * itemsize)) // sublane * sublane)
    rb = _pick_row_block(rows, sublane, rb_cap)
    grid = (pl.cdiv(rows, rb),)

    out2d = pl.pallas_call(
        _h_sigmoid_kernel,
        out_shape=jax.ShapeDtypeStruct((rows, lane), x.dtype),
        grid=grid,
        in_specs=[pl.BlockSpec((rb, lane), lambda i: (i, 0))],
        out_specs=pl.BlockSpec((rb, lane), lambda i: (i, 0)),
        compiler_params=pltpu.CompilerParams(
            dimension_semantics=("parallel",),
            vmem_limit_bytes=32 * 1024 * 1024,
        ),
        cost_estimate=pl.CostEstimate(
            flops=4 * total,
            transcendentals=0,
            bytes_accessed=2 * total * itemsize,
        ),
        # Same-shape/dtype elementwise op: let the output reuse the input
        # buffer when the input is donated / a consumed intermediate.
        input_output_aliases={0: 0} if donate_input else {},
    )(x2d)

    out = out2d
    if padded_total != total:
        out = out.reshape(-1)[:total]
    return out.reshape(orig_shape)


if __name__ == "__main__":
    def ref_fn(t):
        return (jnp.clip(t.astype(jnp.float32) + 3.0, 0.0, 6.0) / 6.0).astype(t.dtype)

    # Small NCHW activation (matches the module's conv-style usage).
    x = jax.random.normal(jax.random.PRNGKey(0), (2, 4, 16, 16), jnp.float32) * 4.0
    out = h_sigmoid(x)
    jax.block_until_ready(out)
    assert out.shape == x.shape and out.dtype == x.dtype
    assert jnp.allclose(out, ref_fn(x), atol=1e-6), "mismatch (small f32)"

    # Medium tensor: exercises the multi-tile (>=4 blocks) parallel grid path.
    x_med = jax.random.normal(jax.random.PRNGKey(1), (4, 16, 128, 128), jnp.float32) * 4.0
    out_med = h_sigmoid(x_med)
    jax.block_until_ready(out_med)
    assert jnp.allclose(out_med, ref_fn(x_med), atol=1e-6), "mismatch (tiled f32)"

    # bf16: dtype-aware sublane / row-block sizing, f32 compute inside kernel.
    x_bf = (jax.random.normal(jax.random.PRNGKey(2), (4, 16, 128, 128), jnp.float32)
            * 4.0).astype(jnp.bfloat16)
    out_bf = h_sigmoid(x_bf)
    jax.block_until_ready(out_bf)
    assert jnp.allclose(out_bf.astype(jnp.float32), ref_fn(x_bf).astype(jnp.float32),
                        atol=4e-3), "mismatch (bf16)"

    # Misaligned element count: pad fallback path.
    x_odd = jax.random.normal(jax.random.PRNGKey(3), (3, 5, 7, 11), jnp.float32) * 4.0
    out_odd = h_sigmoid(x_odd)
    jax.block_until_ready(out_odd)
    assert jnp.allclose(out_odd, ref_fn(x_odd), atol=1e-6), "mismatch (misaligned)"

    # In-place / aliased path: input is a consumed intermediate under jit, so
    # input_output_aliases={0: 0} lets the output reuse its buffer.
    @jax.jit
    def fused_inplace(key):
        t = jax.random.normal(key, (2, 4, 16, 16), jnp.float32) * 4.0
        return h_sigmoid(t, donate_input=True)

    out_al = fused_inplace(jax.random.PRNGKey(4))
    jax.block_until_ready(out_al)
    t_ref = jax.random.normal(jax.random.PRNGKey(4), (2, 4, 16, 16), jnp.float32) * 4.0
    assert jnp.allclose(out_al, ref_fn(t_ref), atol=1e-6), "mismatch (aliased)"

    print("KERNEL_OK")
</pallas_src>

<mosaic_0001>
module attributes {stable_mosaic.version = 11 : i64} {
  func.func @_h_sigmoid_kernel(%arg0: i32, %arg1: memref<2x1024xf32, #tpu.memory_space<vmem>>, %arg2: memref<2x1024xf32, #tpu.memory_space<vmem>>) attributes {dimension_semantics = [#tpu.dimension_semantics<parallel>], iteration_bounds = array<i64: 1>, scalar_prefetch = 0 : i64, scratch_operands = 0 : i64, tpu.core_type = #tpu.core_type<tc>, window_params = [{transform_indices = @transform_0, window_bounds = array<i64: 2, 1024>}, {transform_indices = @transform_1, window_bounds = array<i64: 2, 1024>}]} {
    %c0 = arith.constant 0 : index
    %c0_0 = arith.constant 0 : index
    %0 = vector.load %arg1[%c0, %c0_0] : memref<2x1024xf32, #tpu.memory_space<vmem>>, vector<2x1024xf32>
    %cst = arith.constant 3.000000e+00 : f32
    %1 = vector.broadcast %cst : f32 to vector<2x1024xf32>
    %2 = arith.addf %0, %1 : vector<2x1024xf32>
    %cst_1 = arith.constant 0.000000e+00 : f32
    %cst_2 = arith.constant 6.000000e+00 : f32
    %3 = vector.broadcast %cst_1 : f32 to vector<2x1024xf32>
    %4 = arith.maximumf %3, %2 : vector<2x1024xf32>
    %5 = vector.broadcast %cst_2 : f32 to vector<2x1024xf32>
    %6 = arith.minimumf %5, %4 : vector<2x1024xf32>
    %cst_3 = arith.constant 0.166666672 : f32
    %7 = vector.broadcast %cst_3 : f32 to vector<2x1024xf32>
    %8 = arith.mulf %6, %7 : vector<2x1024xf32>
    %c0_4 = arith.constant 0 : index
    %c0_5 = arith.constant 0 : index
    %9 = vector.load %arg2[%c0_4, %c0_5] : memref<2x1024xf32, #tpu.memory_space<vmem>>, vector<2x1024xf32>
    tpu.vector_store %arg2[%c0_4, %c0_5], %8 {strides = array<i32>} : memref<2x1024xf32, #tpu.memory_space<vmem>>, vector<2x1024xf32>,
    return
  }
  func.func @transform_0(%arg0: i32) -> (i32, i32) {
    %c0_i32 = arith.constant 0 : i32
    %c0_i32_0 = arith.constant 0 : i32
    return %arg0, %c0_i32 : i32, i32
  }
  func.func @transform_1(%arg0: i32) -> (i32, i32) {
    %c0_i32 = arith.constant 0 : i32
    %c0_i32_0 = arith.constant 0 : i32
    return %arg0, %c0_i32 : i32, i32
  }
}

</mosaic_0001>

<bundles_post_ra>
// kernel: tpu_custom_call.1
= control target key start
LH: loop header
LB: loop body
LE: loop exit
PB: predicated region body
PF: predicated region fallthrough
CT: control target
= control target key end

     0   :  { %6 = vsyncpa [#allocation3], 0  ;;  %s124_s0 = inlined_call_operand.hbm [shape: f32[2,1024], index: 0, kind: input, shape index: {}]   ;;  %s125_s1 = inlined_call_operand.hbm [shape: f32[2,1024], index: 1, kind: output, shape index: {}]  }
   0x1   :  { %7 = vsyncpa [#allocation4], 0  ;;  %s13_s8 = sshll.u32 %s124_s0, 4  ;;  %s106_s9 = smov [#allocation2]   ;;  %s14_s8 = int_to_ptr.hbm [resolvable:$true] %s13_s8 }
   0x2   :  { %s15_s10 = sshll.u32 %s106_s9, 4  ;;  %s16_s10 = int_to_ptr.vmem [resolvable:$true] %s15_s10 }
   0x3   :  { %18 = dma.hbm_to_vmem [thread:$0]  %s14_s8, 256, %s16_s10, [#allocation3]  }
   0x4   :  { %102 = dma.done.wait [#allocation3], 256  }
   0x5   :  { %103 = vsyncadd [#allocation3], 4294967040  ;;  %v23_v0 = vld [vmem:[#allocation2] sm:$0xff]  ;;  %v24_v1 = vld [vmem:[#allocation2 + $0x8] sm:$0xff]  ;;  %s107_s11 = smov [#allocation5]   ;;  %s42_s0 = sshll.u32 %s125_s1, 4  ;;  %s43_s0 = int_to_ptr.hbm [resolvable:$true] %s42_s0 }
   0x6   :  { %v25_v2 = vadd.f32 3.0, %v23_v0  ;;  %v26_v3 = vadd.f32 3.0, %v24_v1  ;;  %s40_s12 = sshll.u32 %s107_s11, 4  ;;  %s41_s12 = int_to_ptr.vmem [resolvable:$true] %s40_s12 }
   0x8   :  { %v27_v4 = vmax.f32 %v25_v2, 0.0  ;;  %v28_v5 = vmax.f32 %v26_v3, 0.0 }
   0xa   :  { %v29_v6 = vmin.f32 %v27_v4, 6.0  ;;  %v30_v7 = vmin.f32 %v28_v5, 6.0 }
   0xc   :  { %v31_v8 = vmul.f32 0.16666667, %v29_v6  ;;  %v32_v9 = vmul.f32 0.16666667, %v30_v7 }
   0xe   :  { %33 = vst [vmem:[#allocation5] sm:$0xff] %v31_v8 }
   0xf   :  { %34 = vst [vmem:[#allocation5 + $0x8] sm:$0xff] %v32_v9 }
  0x10   :  { %45 = dma.vmem_to_hbm [thread:$0]  %s41_s12, 256, %s43_s0, [#allocation4]  }
  0x11   :  { %104 = dma.done.wait [#allocation4], 256  }
  0x12   :  { %105 = vsyncadd [#allocation4], 4294967040 }
  0x13   :  { %50 = vsyncpa [#allocation3], 1 }
  0x14   :  { %51 = vsyncpa [#allocation4], 1 }

</bundles_post_ra>
